<compile_context>
chip_gen: v7x
topology: tpu7x:2x2x1
jax: 0.10.0
libtpu: 0.0.40
codegen_flags: <defaults>
</compile_context>

<pallas_src>
import functools

import jax
import jax.numpy as jnp
from jax.experimental import pallas as pl
from jax.experimental.pallas import tpu as pltpu


def _round_up(x, m):
    return (x + m - 1) // m * m


def _round_down(x, m):
    return (x // m) * m


def _vmem_capacity_bytes():
    try:
        return int(pltpu.get_tpu_info().vmem_capacity_bytes)
    except Exception:  # pragma: no cover - conservative (v7x-sized) default
        return 64 << 20


def _per_row_vmem_bytes(c, itemsize):
    # Double-buffered native pred tile + ~4 full-width f32 temporaries
    # + column temporaries / lane-dense labels / slack.
    c_lanes = _round_up(max(int(c), 1), 128)
    return c_lanes * (2 * itemsize + 16) + 4096


def _pick_block_rows(n, c, itemsize, budget_bytes, num_splits):
    per_row = _per_row_vmem_bytes(c, itemsize)
    bn = _round_down(budget_bytes // per_row, 8)
    bn = max(bn, 8)
    bn = min(bn, 16384)  # beyond a few MiB per tile there is no roofline gain
    per_split_rows = _round_up(pl.cdiv(n, num_splits), 8)
    bn = min(bn, max(per_split_rows, 8))
    return int(bn)


def _mae_loss_kernel(pred_ref, labels_ref, out_ref, *, n_total, tiles_per_split,
                     lane_dense_labels):
    s = pl.program_id(0)   # split axis ("parallel"; one per TensorCore on v7x)
    i = pl.program_id(1)   # tile axis within the split ("arbitrary")

    @pl.when(i == 0)
    def _init():
        out_ref[0, 0, 0] = jnp.float32(0.0)

    pred = pred_ref[...].astype(jnp.float32)          # (bn, C), upcast in-kernel
    bn, num_c = pred.shape

    if lane_dense_labels:
        # Labels arrive as a lane-dense (1, 1, bn) int32 tile (contiguous DMA);
        # relayout the bn values to a (bn, 1) column on the XLU (tiny vs exp).
        labels_col = jnp.transpose(labels_ref[0])     # (1, bn) -> (bn, 1)
    else:
        labels_col = labels_ref[...]                  # (bn, 1) int32

    # Row-validity mask uses the *unclamped* global tile index, so padded rows
    # of the last partial tile and fully phantom tiles contribute nothing.
    tile = s * tiles_per_split + i
    row = jax.lax.broadcasted_iota(jnp.int32, (bn, 1), 0)
    valid = (tile * bn + row) < n_total               # (bn, 1) bool

    # Numerically stable softmax, label column only:
    #   p_label = exp(x[label] - m) / sum(exp(x - m)) + 1e-8
    # The label logit is selected from `pred` directly (not from exp(pred-m)),
    # so only one full-width exp array is ever live.
    m = jnp.max(pred, axis=1, keepdims=True)                        # (bn, 1)
    col = jax.lax.broadcasted_iota(jnp.int32, (bn, num_c), 1)       # (bn, C)
    x_lab = jnp.sum(jnp.where(col == labels_col, pred, 0.0),
                    axis=1, keepdims=True)                          # (bn, 1)
    denom = jnp.sum(jnp.exp(pred - m), axis=1, keepdims=True)       # (bn, 1)
    p_label = jnp.exp(x_lab - m) * pl.reciprocal(denom) + 1e-8      # (bn, 1)
    # (the reference adds 1e-8 to every class; only the label column survives
    #  the one-hot dot, so adding it to the picked prob is identical)
    # TODO(synk): optional bf16 exp path for v7x (tolerance-gated) not added;
    # compute stays f32 to match the reference exactly.

    out_ref[0, 0, 0] += jnp.sum(jnp.where(valid, p_label, 0.0))


def mae_loss(pred, labels, num_classes, *, block_rows=None):
    """pred: (N, C) float (any float dtype), labels: (N,) int -> scalar loss."""
    N, C = pred.shape
    assert C == num_classes
    itemsize = jnp.dtype(pred.dtype).itemsize

    vmem_cap = _vmem_capacity_bytes()
    budget = int(0.55 * vmem_cap)          # headroom for compiler scratch

    # v7x has 2 TensorCores per chip; a 2-way "parallel" split axis lets each
    # core own a partial sum.  Harmless extra grid axis on single-TC v5e/v6e.
    num_splits = 2

    if block_rows is None:
        bn = _pick_block_rows(N, C, itemsize, budget, num_splits)
    else:
        bn = int(block_rows)
        assert bn == N or (bn >= 8 and bn % 8 == 0), (
            "block_rows must equal N or be a multiple of 8")
    # TODO(synk): for very large C where no bn>=8 fits the VMEM budget, an
    # inner C-chunk online-softmax loop is needed; not implemented here.

    n_tiles = pl.cdiv(N, bn)
    if n_tiles < num_splits:
        num_splits = 1
    tiles_per_split = pl.cdiv(n_tiles, num_splits)
    total_tiles = num_splits * tiles_per_split
    total_rows = total_tiles * bn

    labels_i32 = labels.astype(jnp.int32)
    labels_pad = jnp.pad(labels_i32, (0, total_rows - N))

    vmem_limit = int(min(max(bn * _per_row_vmem_bytes(C, itemsize) + (8 << 20),
                             32 << 20),
                         int(0.9 * vmem_cap)))

    compiler_params = pltpu.CompilerParams(
        dimension_semantics=("parallel", "arbitrary"),
        vmem_limit_bytes=vmem_limit,
    )
    out_shape = jax.ShapeDtypeStruct((num_splits, 1, 1), jnp.float32)
    out_spec = pl.BlockSpec((1, 1, 1), lambda s, i: (s, 0, 0),
                            memory_space=pltpu.MemorySpace.SMEM)
    # Phantom tiles (only when n_tiles % num_splits != 0) clamp onto the last
    # real block; their rows are masked out inside the kernel.
    pred_spec = pl.BlockSpec(
        (bn, C),
        lambda s, i: (jnp.minimum(s * tiles_per_split + i, n_tiles - 1), 0))
    grid = (num_splits, tiles_per_split)

    def run(lane_dense):
        if lane_dense:
            lab = labels_pad.reshape(total_tiles, 1, bn)
            lab_spec = pl.BlockSpec(
                (1, 1, bn), lambda s, i: (s * tiles_per_split + i, 0, 0))
        else:
            lab = labels_pad.reshape(total_rows, 1)
            lab_spec = pl.BlockSpec(
                (bn, 1), lambda s, i: (s * tiles_per_split + i, 0))
        kernel = functools.partial(
            _mae_loss_kernel, n_total=N, tiles_per_split=tiles_per_split,
            lane_dense_labels=lane_dense)
        return pl.pallas_call(
            kernel,
            out_shape=out_shape,
            grid=grid,
            in_specs=[pred_spec, lab_spec],
            out_specs=out_spec,
            compiler_params=compiler_params,
        )(pred, lab)

    try:
        partials = run(lane_dense=True)
    except Exception:
        # TODO(synk): lane->sublane relayout of the labels tile not supported
        # on this toolchain; fall back to the sublane-strided (rows, 1) labels
        # DMA (correct, just slower for large tiles).
        partials = run(lane_dense=False)

    return (1.0 - jnp.sum(partials) * (1.0 / N)).astype(jnp.float32)


def mae_loss_ref(pred, labels, num_classes):
    one_hot = jax.nn.one_hot(labels, num_classes, dtype=jnp.float32)
    p = jax.nn.softmax(pred.astype(jnp.float32), axis=1) + 1e-8
    return jnp.mean(1.0 - jnp.sum(one_hot * p, axis=1))


if __name__ == "__main__":
    key = jax.random.PRNGKey(0)
    k1, k2, k3, k4 = jax.random.split(key, 4)

    # Case 1: batch=20, classes=32, forced tiny tiles -> exercises the 2-split
    # grid, partial-tile row masking and the phantom-tile clamp.
    N, C = 20, 32
    pred = jax.random.normal(k1, (N, C), dtype=jnp.float32)
    labels = jax.random.randint(k2, (N,), 0, C, dtype=jnp.int32)
    out = jax.block_until_ready(mae_loss(pred, labels, C, block_rows=8))
    ref = mae_loss_ref(pred, labels, C)
    assert jnp.allclose(out, ref, atol=1e-5, rtol=1e-5), (out, ref)

    # Case 2: default VMEM-budget-driven tile size, C not a multiple of 128.
    N, C = 100, 96
    pred = jax.random.normal(k3, (N, C), dtype=jnp.float32)
    labels = jax.random.randint(k4, (N,), 0, C, dtype=jnp.int32)
    out = jax.block_until_ready(mae_loss(pred, labels, C))
    ref = mae_loss_ref(pred, labels, C)
    assert jnp.allclose(out, ref, atol=1e-5, rtol=1e-5), (out, ref)

    # Case 3: bf16 logits (native-dtype DMA, in-kernel upcast path).
    N, C = 64, 128
    pred = jax.random.normal(k1, (N, C), dtype=jnp.float32).astype(jnp.bfloat16)
    labels = jax.random.randint(k2, (N,), 0, C, dtype=jnp.int32)
    out = jax.block_until_ready(mae_loss(pred, labels, C))
    ref = mae_loss_ref(pred, labels, C)
    assert jnp.allclose(out, ref, atol=1e-5, rtol=1e-5), (out, ref)

    print("KERNEL_OK")
</pallas_src>

<mosaic_0001>
module attributes {stable_mosaic.version = 11 : i64} {
  func.func @_mae_loss_kernel(%arg0: i32, %arg1: i32, %arg2: memref<8x32xf32, #tpu.memory_space<vmem>>, %arg3: memref<1x1x8xi32, #tpu.memory_space<vmem>>, %arg4: memref<1x1x1xf32, #tpu.memory_space<smem>>) attributes {dimension_semantics = [#tpu.dimension_semantics<parallel>, #tpu.dimension_semantics<arbitrary>], iteration_bounds = array<i64: 2, 2>, scalar_prefetch = 0 : i64, scratch_operands = 0 : i64, tpu.core_type = #tpu.core_type<tc>, window_params = [{transform_indices = @transform_0, window_bounds = array<i64: 8, 32>}, {transform_indices = @transform_1, window_bounds = array<i64: 1, 1, 8>}, {transform_indices = @transform_2, window_bounds = array<i64: 1, 1, 1>}]} {
    %c0_i32 = arith.constant 0 : i32
    %0 = arith.cmpi eq, %arg1, %c0_i32 : i32
    %1 = arith.extui %0 : i1 to i32
    %c0_i32_0 = arith.constant 0 : i32
    %2 = arith.cmpi ne, %1, %c0_i32_0 : i32
    scf.if %2 {
      %cst_17 = arith.constant 0.000000e+00 : f32
      %c0_18 = arith.constant 0 : index
      %c0_19 = arith.constant 0 : index
      %c0_20 = arith.constant 0 : index
      %44 = memref.load %arg4[%c0_18, %c0_19, %c0_20] : memref<1x1x1xf32, #tpu.memory_space<smem>>
      memref.store %cst_17, %arg4[%c0_18, %c0_19, %c0_20] : memref<1x1x1xf32, #tpu.memory_space<smem>>
    } else {
    }
    %c0 = arith.constant 0 : index
    %c0_1 = arith.constant 0 : index
    %3 = vector.load %arg2[%c0, %c0_1] : memref<8x32xf32, #tpu.memory_space<vmem>>, vector<8x32xf32>
    %c0_2 = arith.constant 0 : index
    %c0_3 = arith.constant 0 : index
    %c0_4 = arith.constant 0 : index
    %4 = vector.load %arg3[%c0_2, %c0_3, %c0_4] : memref<1x1x8xi32, #tpu.memory_space<vmem>>, vector<1x1x8xi32>
    %5 = vector.shape_cast %4 : vector<1x1x8xi32> to vector<1x8xi32>
    %6 = tpu.transpose %5, [1, 0] : vector<1x8xi32> -> vector<8x1xi32>
    %c2_i32 = arith.constant 2 : i32
    %7 = arith.muli %arg0, %c2_i32 : i32
    %8 = arith.addi %7, %arg1 : i32
    %9 = tpu.iota {dimensions = array<i32: 0>} : vector<8x1xi32>
    %c8_i32 = arith.constant 8 : i32
    %10 = arith.muli %8, %c8_i32 : i32
    %11 = vector.broadcast %10 : i32 to vector<8x1xi32>
    %12 = arith.addi %11, %9 : vector<8x1xi32>
    %c20_i32 = arith.constant 20 : i32
    %13 = vector.broadcast %c20_i32 : i32 to vector<8x1xi32>
    %14 = arith.cmpi slt, %12, %13 : vector<8x1xi32>
    %cst = arith.constant dense<0xFF800000> : vector<8xf32>
    %15 = vector.multi_reduction <maximumf>, %3, %cst [1] : vector<8x32xf32> to vector<8xf32>
    %16 = vector.shape_cast %15 : vector<8xf32> to vector<8x1xf32>
    %17 = tpu.iota {dimensions = array<i32: 1>} : vector<8x32xi32>
    %18 = vector.broadcast %6 : vector<8x1xi32> to vector<8x32xi32>
    %19 = arith.cmpi eq, %17, %18 : vector<8x32xi32>
    %cst_5 = arith.constant 0.000000e+00 : f32
    %20 = vector.broadcast %cst_5 : f32 to vector<8x32xf32>
    %21 = arith.select %19, %3, %20 : vector<8x32xi1>, vector<8x32xf32>
    %cst_6 = arith.constant dense<0.000000e+00> : vector<8xf32>
    %22 = vector.multi_reduction <add>, %21, %cst_6 [1] : vector<8x32xf32> to vector<8xf32>
    %23 = vector.shape_cast %22 : vector<8xf32> to vector<8x1xf32>
    %24 = vector.broadcast %16 : vector<8x1xf32> to vector<8x32xf32>
    %25 = arith.subf %3, %24 : vector<8x32xf32>
    %26 = math.exp %25 : vector<8x32xf32>
    %cst_7 = arith.constant dense<0.000000e+00> : vector<8xf32>
    %27 = vector.multi_reduction <add>, %26, %cst_7 [1] : vector<8x32xf32> to vector<8xf32>
    %28 = vector.shape_cast %27 : vector<8xf32> to vector<8x1xf32>
    %29 = arith.subf %23, %16 : vector<8x1xf32>
    %30 = math.exp %29 : vector<8x1xf32>
    %31 = tpu.reciprocal %28 : vector<8x1xf32> -> vector<8x1xf32>
    %32 = arith.mulf %30, %31 : vector<8x1xf32>
    %cst_8 = arith.constant 9.99999993E-9 : f32
    %33 = vector.broadcast %cst_8 : f32 to vector<8x1xf32>
    %34 = arith.addf %32, %33 : vector<8x1xf32>
    %c0_9 = arith.constant 0 : index
    %c0_10 = arith.constant 0 : index
    %c0_11 = arith.constant 0 : index
    %35 = memref.load %arg4[%c0_9, %c0_10, %c0_11] : memref<1x1x1xf32, #tpu.memory_space<smem>>
    %cst_12 = arith.constant 0.000000e+00 : f32
    %36 = vector.broadcast %cst_12 : f32 to vector<8x1xf32>
    %37 = arith.select %14, %34, %36 : vector<8x1xi1>, vector<8x1xf32>
    %38 = vector.shape_cast %37 : vector<8x1xf32> to vector<1x8x1xf32>
    %cst_13 = arith.constant dense<0.000000e+00> : vector<1xf32>
    %39 = vector.multi_reduction <add>, %38, %cst_13 [1, 2] : vector<1x8x1xf32> to vector<1xf32>
    %40 = vector.shape_cast %39 : vector<1xf32> to vector<1x1x1xf32>
    %41 = vector.extract %40[0, 0, 0] : f32 from vector<1x1x1xf32>
    %42 = arith.addf %35, %41 : f32
    %c0_14 = arith.constant 0 : index
    %c0_15 = arith.constant 0 : index
    %c0_16 = arith.constant 0 : index
    %43 = memref.load %arg4[%c0_14, %c0_15, %c0_16] : memref<1x1x1xf32, #tpu.memory_space<smem>>
    memref.store %42, %arg4[%c0_14, %c0_15, %c0_16] : memref<1x1x1xf32, #tpu.memory_space<smem>>
    return
  }
  func.func @transform_0(%arg0: i32, %arg1: i32) -> (i32, i32) {
    %c2_i32 = arith.constant 2 : i32
    %0 = arith.muli %arg0, %c2_i32 : i32
    %1 = arith.addi %0, %arg1 : i32
    %c2_i32_0 = arith.constant 2 : i32
    %2 = arith.minsi %1, %c2_i32_0 : i32
    %c0_i32 = arith.constant 0 : i32
    %c0_i32_1 = arith.constant 0 : i32
    return %2, %c0_i32 : i32, i32
  }
  func.func @transform_1(%arg0: i32, %arg1: i32) -> (i32, i32, i32) {
    %c2_i32 = arith.constant 2 : i32
    %0 = arith.muli %arg0, %c2_i32 : i32
    %1 = arith.addi %0, %arg1 : i32
    %c0_i32 = arith.constant 0 : i32
    %c0_i32_0 = arith.constant 0 : i32
    %c0_i32_1 = arith.constant 0 : i32
    return %1, %c0_i32, %c0_i32_0 : i32, i32, i32
  }
  func.func @transform_2(%arg0: i32, %arg1: i32) -> (i32, i32, i32) {
    %c0_i32 = arith.constant 0 : i32
    %c0_i32_0 = arith.constant 0 : i32
    %c0_i32_1 = arith.constant 0 : i32
    return %arg0, %c0_i32, %c0_i32_0 : i32, i32, i32
  }
}

module attributes {stable_mosaic.version = 11 : i64} {
  func.func @_mae_loss_kernel(%arg0: i32, %arg1: i32, %arg2: memref<8x32xf32, #tpu.memory_space<vmem>>, %arg3: memref<8x1xi32, #tpu.memory_space<vmem>>, %arg4: memref<1x1x1xf32, #tpu.memory_space<smem>>) attributes {dimension_semantics = [#tpu.dimension_semantics<parallel>, #tpu.dimension_semantics<arbitrary>], iteration_bounds = array<i64: 2, 2>, scalar_prefetch = 0 : i64, scratch_operands = 0 : i64, tpu.core_type = #tpu.core_type<tc>, window_params = [{transform_indices = @transform_0, window_bounds = array<i64: 8, 32>}, {transform_indices = @transform_1, window_bounds = array<i64: 8, 1>}, {transform_indices = @transform_2, window_bounds = array<i64: 1, 1, 1>}]} {
    %c0_i32 = arith.constant 0 : i32
    %0 = arith.cmpi eq, %arg1, %c0_i32 : i32
    %1 = arith.extui %0 : i1 to i32
    %c0_i32_0 = arith.constant 0 : i32
    %2 = arith.cmpi ne, %1, %c0_i32_0 : i32
    scf.if %2 {
      %cst_16 = arith.constant 0.000000e+00 : f32
      %c0_17 = arith.constant 0 : index
      %c0_18 = arith.constant 0 : index
      %c0_19 = arith.constant 0 : index
      %42 = memref.load %arg4[%c0_17, %c0_18, %c0_19] : memref<1x1x1xf32, #tpu.memory_space<smem>>
      memref.store %cst_16, %arg4[%c0_17, %c0_18, %c0_19] : memref<1x1x1xf32, #tpu.memory_space<smem>>
    } else {
    }
    %c0 = arith.constant 0 : index
    %c0_1 = arith.constant 0 : index
    %3 = vector.load %arg2[%c0, %c0_1] : memref<8x32xf32, #tpu.memory_space<vmem>>, vector<8x32xf32>
    %c0_2 = arith.constant 0 : index
    %c0_3 = arith.constant 0 : index
    %4 = vector.load %arg3[%c0_2, %c0_3] : memref<8x1xi32, #tpu.memory_space<vmem>>, vector<8x1xi32>
    %c2_i32 = arith.constant 2 : i32
    %5 = arith.muli %arg0, %c2_i32 : i32
    %6 = arith.addi %5, %arg1 : i32
    %7 = tpu.iota {dimensions = array<i32: 0>} : vector<8x1xi32>
    %c8_i32 = arith.constant 8 : i32
    %8 = arith.muli %6, %c8_i32 : i32
    %9 = vector.broadcast %8 : i32 to vector<8x1xi32>
    %10 = arith.addi %9, %7 : vector<8x1xi32>
    %c20_i32 = arith.constant 20 : i32
    %11 = vector.broadcast %c20_i32 : i32 to vector<8x1xi32>
    %12 = arith.cmpi slt, %10, %11 : vector<8x1xi32>
    %cst = arith.constant dense<0xFF800000> : vector<8xf32>
    %13 = vector.multi_reduction <maximumf>, %3, %cst [1] : vector<8x32xf32> to vector<8xf32>
    %14 = vector.shape_cast %13 : vector<8xf32> to vector<8x1xf32>
    %15 = tpu.iota {dimensions = array<i32: 1>} : vector<8x32xi32>
    %16 = vector.broadcast %4 : vector<8x1xi32> to vector<8x32xi32>
    %17 = arith.cmpi eq, %15, %16 : vector<8x32xi32>
    %cst_4 = arith.constant 0.000000e+00 : f32
    %18 = vector.broadcast %cst_4 : f32 to vector<8x32xf32>
    %19 = arith.select %17, %3, %18 : vector<8x32xi1>, vector<8x32xf32>
    %cst_5 = arith.constant dense<0.000000e+00> : vector<8xf32>
    %20 = vector.multi_reduction <add>, %19, %cst_5 [1] : vector<8x32xf32> to vector<8xf32>
    %21 = vector.shape_cast %20 : vector<8xf32> to vector<8x1xf32>
    %22 = vector.broadcast %14 : vector<8x1xf32> to vector<8x32xf32>
    %23 = arith.subf %3, %22 : vector<8x32xf32>
    %24 = math.exp %23 : vector<8x32xf32>
    %cst_6 = arith.constant dense<0.000000e+00> : vector<8xf32>
    %25 = vector.multi_reduction <add>, %24, %cst_6 [1] : vector<8x32xf32> to vector<8xf32>
    %26 = vector.shape_cast %25 : vector<8xf32> to vector<8x1xf32>
    %27 = arith.subf %21, %14 : vector<8x1xf32>
    %28 = math.exp %27 : vector<8x1xf32>
    %29 = tpu.reciprocal %26 : vector<8x1xf32> -> vector<8x1xf32>
    %30 = arith.mulf %28, %29 : vector<8x1xf32>
    %cst_7 = arith.constant 9.99999993E-9 : f32
    %31 = vector.broadcast %cst_7 : f32 to vector<8x1xf32>
    %32 = arith.addf %30, %31 : vector<8x1xf32>
    %c0_8 = arith.constant 0 : index
    %c0_9 = arith.constant 0 : index
    %c0_10 = arith.constant 0 : index
    %33 = memref.load %arg4[%c0_8, %c0_9, %c0_10] : memref<1x1x1xf32, #tpu.memory_space<smem>>
    %cst_11 = arith.constant 0.000000e+00 : f32
    %34 = vector.broadcast %cst_11 : f32 to vector<8x1xf32>
    %35 = arith.select %12, %32, %34 : vector<8x1xi1>, vector<8x1xf32>
    %36 = vector.shape_cast %35 : vector<8x1xf32> to vector<1x8x1xf32>
    %cst_12 = arith.constant dense<0.000000e+00> : vector<1xf32>
    %37 = vector.multi_reduction <add>, %36, %cst_12 [1, 2] : vector<1x8x1xf32> to vector<1xf32>
    %38 = vector.shape_cast %37 : vector<1xf32> to vector<1x1x1xf32>
    %39 = vector.extract %38[0, 0, 0] : f32 from vector<1x1x1xf32>
    %40 = arith.addf %33, %39 : f32
    %c0_13 = arith.constant 0 : index
    %c0_14 = arith.constant 0 : index
    %c0_15 = arith.constant 0 : index
    %41 = memref.load %arg4[%c0_13, %c0_14, %c0_15] : memref<1x1x1xf32, #tpu.memory_space<smem>>
    memref.store %40, %arg4[%c0_13, %c0_14, %c0_15] : memref<1x1x1xf32, #tpu.memory_space<smem>>
    return
  }
  func.func @transform_0(%arg0: i32, %arg1: i32) -> (i32, i32) {
    %c2_i32 = arith.constant 2 : i32
    %0 = arith.muli %arg0, %c2_i32 : i32
    %1 = arith.addi %0, %arg1 : i32
    %c2_i32_0 = arith.constant 2 : i32
    %2 = arith.minsi %1, %c2_i32_0 : i32
    %c0_i32 = arith.constant 0 : i32
    %c0_i32_1 = arith.constant 0 : i32
    return %2, %c0_i32 : i32, i32
  }
  func.func @transform_1(%arg0: i32, %arg1: i32) -> (i32, i32) {
    %c2_i32 = arith.constant 2 : i32
    %0 = arith.muli %arg0, %c2_i32 : i32
    %1 = arith.addi %0, %arg1 : i32
    %c0_i32 = arith.constant 0 : i32
    %c0_i32_0 = arith.constant 0 : i32
    return %1, %c0_i32 : i32, i32
  }
  func.func @transform_2(%arg0: i32, %arg1: i32) -> (i32, i32, i32) {
    %c0_i32 = arith.constant 0 : i32
    %c0_i32_0 = arith.constant 0 : i32
    %c0_i32_1 = arith.constant 0 : i32
    return %arg0, %c0_i32, %c0_i32_0 : i32, i32, i32
  }
}

</mosaic_0001>

<bundles_post_ra>
// kernel: tpu_custom_call.1
= control target key start
LH: loop header
LB: loop body
LE: loop exit
PB: predicated region body
PF: predicated region fallthrough
CT: control target
= control target key end

     0   :  { %7 = vsyncpa [#allocation3], 0  ;;  %s1160_s0 = inlined_call_operand.hbm [shape: f32[20,32], index: 0, kind: input, shape index: {}]   ;;  %s1161_s1 = inlined_call_operand.hbm [shape: s32[4,1,8], index: 1, kind: input, shape index: {}]   ;;  %s1162_s2 = inlined_call_operand.vmem [shape: f32[2,1,1], index: 2, kind: output, shape index: {}]  }
   0x1   :  { %9 = vsyncpa [#allocation3 + $0x1], 0 }
   0x2   :  { %10 = vsyncpa [#allocation6], 0 }
   0x3   :  { %12 = vsyncpa [#allocation6 + $0x1], 0 }
   0x4   :  { %13 = vsyncpa [#allocation4], 0 }
   0x5   :  { %15 = vsyncpa [#allocation4 + $0x1], 0  ;;  %s816_s9 = smov 0   ;;  %s818_s10 = smov 0  }
   0x6   :  { %s820_s11 = smov 0   ;;  %s822_s12 = smov 0  }
   0x7   :  { %s824_s13 = smov 0   ;;  %s826_s14 = smov 0  }
   0x8   :  { %s828_s15 = smov 0   ;;  %s830_s16 = smov 0  }
   0x9   :  { %s832_s17 = smov 0   ;;  %s834_s18 = smov 0  }
   0xa   :  { %s836_s19 = smov 0   ;;  %s838_s20 = smov 0  }
   0xb   :  { %s840_s21 = smov 0   ;;  %s842_s22 = smov 0  }
   0xc LB: > { %1174 = sst [smem:[#allocation11_spill]] %s787_s20  ;;  %s435_s23 = sadd.s32 4294967295, %s795_s22   ;;  %s795_s22 = sphi %s842_s22, %s21_s22   ;;  %s791_s21 = sphi %s840_s21, %s1206_s21   ;;  %s787_s20 = sphi %s838_s20, %s1205_s20   ;;  %s783_s19 = sphi %s836_s19, %s1204_s19   ;;  %s779_s18 = sphi %s834_s18, %s1203_s18   ;;  %s775_s17 = sphi %s832_s17, %s1215_s17   ;;  %s771_s16 = sphi %s830_s16, %s1214_s16   ;;  %s767_s15 = sphi %s828_s15, %s1213_s15   ;;  %s763_s14 = sphi %s826_s14, %s1212_s14   ;;  %s759_s13 = sphi %s824_s13, %s1211_s13   ;;  %s755_s12 = sphi %s822_s12, %s1210_s12   ;;  %s751_s11 = sphi %s820_s11, %s1209_s11   ;;  %s747_s10 = sphi %s818_s10, %s1208_s10   ;;  %s743_s9 = sphi %s816_s9, %s1207_s9  }
   0xd   : > { %1175 = sst [smem:[#allocation12_spill]] %s791_s21  ;;  %s30_s25 = sadd.s32 1, %s787_s20 }
   0xe   : > { %s33_s26 = sadd.s32 1, %s791_s21  ;;  %p31_p0 = scmp.ge.s32.totalorder %s30_s25, 2 }
   0xf   : > { %s437_s27 = sshll.u32 %s791_s21, 1  ;;  %s48_s29 = sadd.s32 1, %s775_s17 }
  0x10   : > { %s892_s28 = sadd.s32 %s787_s20, %s437_s27  ;;  %s1217_s25 = smov (%p31_p0, %s30_s25), 0 }
  0x11   : > { %1176 = sst [smem:[#allocation13_spill]] %s1217_s25  ;;  %s1219_s26 = smov (!%p31_p0, %s33_s26), %s791_s21 }
  0x12   : > { %p39_p1 = scmp.lt.s32.totalorder %s892_s28, 2  ;;  %p55_p2 = scmp.ne.s32.totalorder %s775_s17, %s771_s16 }
  0x13   : > { %p35_p3 = scmp.ge.s32.totalorder %s1219_s26, 2  ;;  %p1167_p4 = scmp.eq.s32.totalorder %s795_s22, 0 }
  0x14   : > { %s903_s30 = scalar_select %p39_p1, %s892_s28, 2 }
  0x15   : > { %s1221_s26 = smov (%p35_p3, %s1219_s26), 0  ;;  %p909_p5 = por %p1167_p4, %p55_p2 }
  0x16   : > { %1177 = sst [smem:[#allocation14_spill]] %s1221_s26  ;;  %p61_p6 = scmp.ne.s32.totalorder %s771_s16, %s767_s15 }
  0x17   : > { %s438_s4 = sshll.u32 %s1221_s26, 1  ;;  %p918_p7 = scmp.eq.s32.totalorder %s435_s23, 0 }
  0x18   : > { %s42_s6 = sadd.s32 %s438_s4, %s1217_s25  ;;  %s101_s7 = ssub.s32 %s791_s21, %s1221_s26 }
  0x19   : > { %s1179_s5 = scalar_select %p918_p7, 1, 0 }
  0x1a   : > { %p43_p8 = scmp.lt.s32.totalorder %s42_s6, 2  ;;  %p927_p9 = por %p918_p7, %p61_p6 }
  0x1b   : > { %s75_s15 = ssub.s32 %s892_s28, %s42_s6  ;;  %p102_p10 = scmp.eq.s32.totalorder %s101_s7, 0 }
  0x1c   : > { %s1180_s8 = scalar_select %p927_p9, 1, 0 }
  0x1d   : > { %s1223_s6 = smov (!%p43_p8, %s42_s6), 2  ;;  %p932_p11 = scmp.eq.s32.totalorder %s75_s15, 0 }
  0x1e   : > { %s104_s4 = sadd.s32 1, %s751_s11  ;;  %s45_s24 = ssub.s32 %s903_s30, %s1223_s6 }
  0x1f   : > { %p114_p12 = scmp.ne.s32.totalorder %s751_s11, %s747_s10  ;;  %p46_p13 = scmp.eq.s32.totalorder %s45_s24, 0 }
  0x20   : > { %p115_p0 = scmp.eq.s32.totalorder %s435_s23, 3  ;;  %p120_p2 = scmp.ne.s32.totalorder %s747_s10, %s743_s9 }
  0x21   : > { %s943_s26 = scalar_select %p102_p10, %s751_s11, %s104_s4  }
  0x22   : > { %s946_s25 = scalar_select %p46_p13, %s775_s17, %s48_s29  }
  0x23   : > { %1182 = sst [smem:[#allocation15_spill]] %s943_s26  ;;  %p948_p1 = por %p115_p0, %p114_p12 }
  0x24   : > { %1183 = sst [smem:[#allocation16_spill]] %s946_s25  ;;  %s1185_s15 = sadd.s32 4294967294, %s795_s22  }
  0x25   : > { %s1184_s7 = scalar_select %p948_p1, 1, 0 }
  0x26   : > { %p121_p3 = scmp.eq.s32.totalorder %s1185_s15, 3  ;;  %p1168_p6 = scmp.lt.s32.totalorder %s795_s22, 4 }
  0x27   : > { %s141_s6 = sand.u32 1, %s775_s17   ;;  %s445_s24 = sshll.u32 %s903_s30, 7 }
  0x28   : > { %p958_p8 = por %p121_p3, %p120_p2  ;;  %s443_s23 = sshll.u32 %s141_s6, 3 }
  0x29   : > { %s966_s29 = scalar_lea.hbm %s1160_s0, %s445_s24  ;;  %s145_s25 = scalar_lea.vmem [#allocation2], %s443_s23 }
  0x2a   : > { %s1186_s21 = scalar_select %p958_p8, 1, 0 }
  0x2b   : > { %s156_s26 = sshll.u32 %s145_s25, 4  ;;  %p972_p10 = pnand %p1168_p6, %p909_p5  ;;  %s976_s26 = int_to_ptr.vmem [resolvable:$true] %s156_s26 }
  0x2c   : > { %s142_s20 = scalar_lea.sflag [#allocation3], %s141_s6  ;;  %s599_s30 = scalar_lea.hbm %s966_s29, 128 }
  0x2d   : > { %p600_p0 = scmp.ne.s32.totalorder %s966_s29, %s599_s30  ;;  %p601_p2 = pneg %p972_p10 }
  0x2e   : > { %s604_s23 = scalar_lea.hbm %s1160_s0, 384  ;;  %p605_p5 = scmp.lt.u32.totalorder %s966_s29, %s1160_s0 }
  0x2f   : > { %p602_p3 = pnand %p601_p2, %p600_p0  ;;  %p606_p6 = scmp.lt.u32.totalorder %s604_s23, %s599_s30 }
  0x30   : > { %p608_p13 = scmp.lt.u32.totalorder %s599_s30, %s966_s29 }
  0x31   : > { %p603_p4 = pneg %p602_p3  ;;  %p607_p12 = por %p606_p6, %p605_p5 }
  0x33   : > { %p609_p8 = por %p608_p13, %p607_p12 }
  0x35   : > { %p610_p1 = pnand %p609_p8, %p603_p4 }
  0x37   : > { %613 = shalt.err (!%p610_p1)
}
  0x38   : > { %s614_s6 = scalar_lea.vmem %s976_s26, 128  ;;  %s797_s25 = smov [#allocation2]  }
  0x39   : > { %p615_p0 = scmp.ne.s32.totalorder %s976_s26, %s614_s6  ;;  %s619_s3 = sshll.u32 %s797_s25, 4  ;;  %s620_s3 = int_to_ptr.vmem [resolvable:$false] %s619_s3 }
  0x3a   : > { %s621_s24 = scalar_lea.vmem %s620_s3, 256  ;;  %p622_p7 = scmp.lt.s32.totalorder %s976_s26, %s620_s3 }
  0x3b   : > { %p617_p3 = pnand %p615_p0, %p601_p2  ;;  %p623_p6 = scmp.lt.s32.totalorder %s621_s24, %s614_s6 }
  0x3d   : > { %p618_p9 = pneg %p617_p3  ;;  %p624_p5 = por %p623_p6, %p622_p7 }
  0x3f   : > { %p625_p12 = pnand %p624_p5, %p618_p9 }
  0x41   : > { %628 = shalt.err (!%p625_p12)
}
  0x42   : > { %471 = dma.hbm_to_vmem [thread:$0]  (!%p972_p10), %s966_s29, 128, %s976_s26, %s142_s20  }
  0x43   : > { %p1188_p4 = scmp.lt.s32.totalorder %s795_s22, 5  ;;  %p1189_p7 = scmp.ge.s32.totalorder %s795_s22, 1 }
  0x44   : > { %s78_s30 = sadd.s32 1, %s763_s14  ;;  %p85_p1 = scmp.ne.s32.totalorder %s763_s14, %s759_s13 }
  0x45   : > { %p1009_p9 = pnand %p1189_p7, %p1188_p4  ;;  %p91_p8 = scmp.ne.s32.totalorder %s759_s13, %s755_s12 }
  0x46   : > { %s1017_s23 = scalar_select %p932_p11, %s763_s14, %s78_s30  }
  0x47   : > { %s163_s4 = sand.u32 1, %s763_s14   ;;  %s447_s6 = sshll.u32 %s892_s28, 4 }
  0x48   : > { %p1191_p13 = scmp.eq.s32.totalorder %s795_s22, 0  ;;  %p1192_p0 = scmp.ne.s32.totalorder %s1179_s5, 0 }
  0x49   : > { %s1036_s20 = scalar_lea.hbm %s1161_s1, %s447_s6  ;;  %s166_s27 = scalar_lea.vmem [#allocation5], %s163_s4 }
  0x4a   : > { %p87_p2 = por %p85_p1, %p1191_p13  ;;  %p1029_p3 = por %p91_p8, %p1192_p0 }
  0x4b   : > { %s175_s12 = sshll.u32 %s166_s27, 4  ;;  %p1194_p11 = scmp.lt.s32.totalorder %s795_s22, 4  ;;  %s1038_s12 = int_to_ptr.vmem [resolvable:$true] %s175_s12 }
  0x4c   : > { %s1193_s25 = scalar_select %p1029_p3, 1, 0 }
  0x4d   : > { %p1042_p10 = pnand %p1194_p11, %p87_p2  ;;  %s164_s5 = scalar_lea.sflag [#allocation6], %s163_s4 }
  0x4e   : > { %s629_s3 = scalar_lea.hbm %s1036_s20, 16  ;;  %s634_s6 = scalar_lea.hbm %s1161_s1, 64 }
  0x4f   : > { %p630_p6 = scmp.ne.s32.totalorder %s1036_s20, %s629_s3  ;;  %p631_p5 = pneg %p1042_p10 }
  0x50   : > { %p635_p7 = scmp.lt.u32.totalorder %s1036_s20, %s1161_s1  ;;  %p636_p1 = scmp.lt.u32.totalorder %s634_s6, %s629_s3 }
  0x51   : > { %p632_p12 = pnand %p631_p5, %p630_p6  ;;  %p638_p13 = scmp.lt.u32.totalorder %s629_s3, %s1036_s20 }
  0x52   : > { %p637_p8 = por %p636_p1, %p635_p7 }
  0x53   : > { %p633_p4 = pneg %p632_p12 }
  0x54   : > { %p639_p2 = por %p638_p13, %p637_p8 }
  0x56   : > { %p640_p0 = pnand %p639_p2, %p633_p4 }
  0x58   : > { %643 = shalt.err (!%p640_p0)
}
  0x59   : > { %s644_s4 = scalar_lea.vmem %s1038_s12, 16  ;;  %s798_s27 = smov [#allocation5]  }
  0x5a   : > { %p645_p11 = scmp.ne.s32.totalorder %s1038_s12, %s644_s4  ;;  %s649_s24 = sshll.u32 %s798_s27, 4  ;;  %s650_s24 = int_to_ptr.vmem [resolvable:$false] %s649_s24 }
  0x5b   : > { %s651_s30 = scalar_lea.vmem %s650_s24, 32  ;;  %p652_p3 = scmp.lt.s32.totalorder %s1038_s12, %s650_s24 }
  0x5c   : > { %p647_p6 = pnand %p645_p11, %p631_p5  ;;  %p653_p7 = scmp.lt.s32.totalorder %s651_s30, %s644_s4 }
  0x5e   : > { %p648_p12 = pneg %p647_p6  ;;  %p654_p1 = por %p653_p7, %p652_p3 }
  0x60   : > { %p655_p8 = pnand %p654_p1, %p648_p12 }
  0x62   : > { %658 = shalt.err (!%p655_p8)
}
  0x63   : > { %474 = dma.hbm_to_vmem [thread:$0]  (!%p1042_p10), %s1036_s20, 16, %s1038_s12, %s164_s5  }
  0x64   : > { %184 = sbr.rel (%p1009_p9) target bundleno = 745 (0x2e9), region = 28  ;;  %s186_s3 = sand.u32 (!%p1009_p9), 1, %s771_s16  }
  0x65   : > { %s449_s6 = sshll.u32 (!%p1009_p9), %s186_s3, 3  ;;  %s187_s26 = scalar_lea.sflag (!%p1009_p9), [#allocation3], %s186_s3 }
  0x66   : > { %s190_s29 = scalar_lea.vmem (!%p1009_p9), [#allocation2], %s449_s6  ;;  %p1196_p5 = scmp.ne.s32.totalorder (!%p1009_p9), %s1180_s8, 0 }
  0x6b   : > { %730 = dma.done.wait (%p1196_p5), %s187_s26, 128  }
  0x6c   : > { %732 = vsyncadd (%p1196_p5), %s187_s26, 4294967168  ;;  %s195_s28 = sand.u32 1, %s759_s13   ;;  %p1197_p3 = scmp.ne.s32.totalorder %s1193_s25, 0 }
  0x6d   : > { %s196_s4 = scalar_lea.sflag [#allocation6], %s195_s28  ;;  %s198_s27 = scalar_lea.vmem [#allocation5], %s195_s28 }
  0x6e   : > { %734 = dma.done.wait (%p1197_p3), %s196_s4, 16  }
  0x6f   : > { %736 = vsyncadd (%p1197_p3), %s196_s4, 4294967280  ;;  %v799_v0 = vmov 0   ;;  %v236_v1 = vld [vmem:[%s198_s27] sm:$0x1]  ;;  %vm277_vm0 = vcmask 261120   ;;  %v271_v8 = vlaneseq  ;;  %s452_s8 = sshll.u32 %s783_s19, 1 }
  0x70   : > { %591 = vset.pattern.permute.xlu1 %v799_v0  ;;  %237 = vxpose.xlu0.b32.start.end [1/1] (short) (narrow) %v236_v1, 8  ;;  %v235_v2 = vld [vmem:[%s190_s29] sm:$0xff]  ;;  %s270_s15 = sadd.s32 %s779_s18, %s452_s8  ;;  %vm305_vm3 = vcmask 7168   ;;  %s220_s20 = sand.u32 1, %s747_s10  }
  0x71   : > { %v278_v3 = vsel %vm277_vm0, %v235_v2, -inf  ;;  %v282_v9 = vand.u32 127, %v271_v8  ;;  %s453_s25 = sshll.u32 %s270_s15, 3  ;;  %v272_v19 = vshrl.u32 %v271_v8, 7  ;;  %p476_p9 = scmp.eq.s32.totalorder %s779_s18, 0 }
  0x72   : > { %v274_v20 = vstv %s453_s25  ;;  %s450_s12 = sshll.u32 %s220_s20, 7  ;;  %s800_s24 = smov 0.0  }
  0x73   : > { %v275_v21 = vadd.s32 %v274_v20, %v272_v19  ;;  %s1090_s5 = scalar_lea.smem [#allocation7], %s450_s12  ;;  %s330_s18 = scalar_lea.vmem %s1162_s2, %s783_s19 }
  0x74   : > { %465 = sst [smem:[%s1090_s5]] (%p476_p9), %s800_s24  ;;  %s332_s26 = sshll.u32 %s330_s18, 4  ;;  %s333_s26 = int_to_ptr.vmem [resolvable:$true] %s332_s26 }
  0x75   : > { %vm276_vm2 = vcmp.lt.s32.totalorder %v275_v21, 20  ;;  %s454_s30 = sld [smem:[#allocation7 + %s450_s12]]  ;;  %s320_s4 = scalar_lea.sflag [#allocation4], %s220_s20 }
  0x76   : > { %s659_s27 = scalar_lea.vmem %s333_s26, 16  ;;  %p1198_p4 = scmp.ne.s32.totalorder %s1184_s7, 0 }
  0x77   : > { %p660_p10 = scmp.ne.s32.totalorder %s333_s26, %s659_s27  ;;  %s663_s25 = sshll.u32 %s1162_s2, 4  ;;  %s664_s25 = int_to_ptr.vmem [resolvable:$false] %s663_s25 }
  0x78   : > { %s665_s12 = scalar_lea.vmem %s664_s25, 32  ;;  %p666_p0 = scmp.lt.s32.totalorder %s333_s26, %s664_s25 }
  0x79   : > { %p661_p13 = pnand %p660_p10, %p1198_p4  ;;  %p667_p11 = scmp.lt.s32.totalorder %s665_s12, %s659_s27 }
  0x7b   : > { %p662_p2 = pneg %p661_p13  ;;  %p668_p6 = por %p667_p11, %p666_p0 }
  0x7d   : > { %p669_p12 = pnand %p668_p6, %p662_p2 }
  0x99   : > { %592 = vset.pattern.permute.xlu0 %v799_v0 }
  0x9d   : > { %279 = vmax.xlane.f32.xlu0 %v278_v3 }
  0xf0   : > { %v253_v4 = vpop.trf.xlu0 }
  0xf1   : > { %284 = vperm.xlu1 %591, %v253_v4  }
 0x12a   : > { %v280_v5 = vpop.xlane.xlu0 %279 }
 0x12b   : > { %v291_v6 = vsub.f32 %v235_v2, %v280_v5 }
 0x12d   : > { %v292_v7 = vmul.f32 1.442695, %v291_v6 }
 0x12f   : > { %593 = vpow2.f32 %v292_v7 }
 0x139   : > { %v594_v11 = vpop.eup %593 }
 0x13a   : > { %v294_v14 = vsel %vm277_vm0, %v594_v11, 0.0 }
 0x170   : > { %v285_v10 = vpop.permute.xlu1 %284 }
 0x171   : > { %vm286_vm1 = vcmp.eq.s32.totalorder %v282_v9, %v285_v10 }
 0x172   : > { %v287_v12 = vsel %vm286_vm1, %v235_v2, 0.0 }
 0x173   : > { %v288_v13 = vsel %vm277_vm0, %v287_v12, 0.0 }
 0x174   : > { %289 = vadd.xlane.f32.xlu1 %v288_v13 }
 0x178   : > { %295 = vadd.xlane.f32.xlu1 %v294_v14 }
 0x201   : > { %v290_v15 = vpop.xlane.xlu1 %289 }
 0x202   : > { %v297_v16 = vsub.f32 %v290_v15, %v280_v5 }
 0x204   : > { %v298_v17 = vmul.f32 1.442695, %v297_v16 }
 0x205   : > { %v296_v18 = vpop.xlane.xlu1 %295 }
 0x206   : > { %595 = vpow2.f32 %v298_v17 }
 0x207   : > { %597 = vrcp.f32 %v296_v18 }
 0x210   : > { %v596_v22 = vpop.eup %595 }
 0x211   : > { %v598_v23 = vpop.eup %597 }
 0x212   : > { %v301_v24 = vmul.f32 %v598_v23, %v596_v22 }
 0x214   : > { %v302_v25 = vadd.f32 1e-08, %v301_v24 }
 0x216   : > { %v304_v26 = vsel %vm276_vm2, %v302_v25, 0.0 }
 0x217   : > { %v306_v27 = vsel %vm305_vm3, %v304_v26, 0.0 }
 0x218   : > { %307 = vadd.xlane.f32.xlu1 %v306_v27 }
 0x2a5   : > { %v308_v28 = vpop.xlane.xlu1 %307 }
 0x2a6   : > { %v309_v29 = vrot.slane %v308_v28, 4 }
 0x2a8   : > { %v310_v30 = vadd.f32 %v309_v29, %v308_v28 }
 0x2aa   : > { %v311_v31 = vrot.slane %v310_v30, 2 }
 0x2ac   : > { %v312_v32 = vadd.f32 %v311_v31, %v310_v30 }
 0x2ae   : > { %v313_v33 = vrot.slane %v312_v32, 1 }
 0x2b0   : > { %v314_v34 = vadd.f32 %v313_v33, %v312_v32 }
 0x2b2   : > { %458 = vpush %v314_v34 }
 0x2e3   : > { %s459_s29 = spop %458 }
 0x2e4   : > { %s316_s28 = sadd.f32 %s459_s29, %s454_s30 }
 0x2e6   : > { %318 = sst [smem:[%s1090_s5]] %s316_s28 }
 0x2e7   : > { %672 = shalt.err (!%p669_p12)
}
 0x2e8   : > { %466 = dma.smem_to_vmem (%p1198_p4), %s1090_s5, 16, %s333_s26, %s320_s4  }
 0x2e9 PF: > { %p457_p7 = scmp.lt.s32.totalorder %s795_s22, 2 }
 0x2ea   : > { %s344_s19 = sand.u32 (!%p457_p7), 1, %s743_s9   ;;  %p1199_p1 = scmp.ne.s32.totalorder (!%p457_p7), %s1186_s21, 0 }
 0x2eb   : > { %339 = sbr.rel (%p457_p7) target bundleno = 757 (0x2f5), region = 48  ;;  %s345_s20 = scalar_lea.sflag (!%p457_p7), [#allocation4], %s344_s19 }
 0x2f2   : > { %738 = dma.done.wait (%p1199_p1), %s345_s20, 16  }
 0x2f3   : > { %740 = vsyncadd (%p1199_p1), %s345_s20, 4294967280 }
 0x2f4   : > { %350 = sfence }
 0x2f5 PF: > { %s21_s22 = sadd.s32 1, %s795_s22   ;;  %s1201_s5 = sld [smem:[#allocation15_spill]] }
 0x2f6   : > { %p1113_p8 = scmp.ge.s32.totalorder %s21_s22, 6   ;;  %s1202_s24 = sld [smem:[#allocation16_spill]] }
 0x2f7   : > { %s1203_s18 = sld [smem:[#allocation11_spill]]  ;;  %s1204_s19 = sld [smem:[#allocation12_spill]] }
 0x2f8   : > { %s1205_s20 = sld [smem:[#allocation13_spill]]  ;;  %s1206_s21 = sld [smem:[#allocation14_spill]] }
 0x2f9   : > { %s1207_s9 = smov %s747_s10  ;;  %s1208_s10 = smov %s751_s11 }
 0x2fa   : > { %s1210_s12 = smov %s759_s13  ;;  %s1211_s13 = smov %s763_s14 }
 0x2fb   : > { %s1209_s11 = smov %s1201_s5  ;;  %s1212_s14 = smov %s1017_s23 }
 0x2fc   : > { %s1213_s15 = smov %s771_s16  ;;  %s1214_s16 = smov %s775_s17 }
 0x2fd   : > { %s1215_s17 = smov %s1202_s24  ;;  %20 = sbr.rel (!%p1113_p8) target bundleno = 12 (0xc), region = 92 }
 0x304   :  { %351 = vsyncpa [#allocation3], 1 }
 0x305   :  { %353 = vsyncpa [#allocation3 + $0x1], 1 }
 0x306   :  { %354 = vsyncpa [#allocation6], 1 }
 0x307   :  { %356 = vsyncpa [#allocation6 + $0x1], 1 }
 0x308   :  { %357 = vsyncpa [#allocation4], 1 }
 0x309   :  { %359 = vsyncpa [#allocation4 + $0x1], 1 }

// kernel: tpu_custom_call.1
= control target key start
LH: loop header
LB: loop body
LE: loop exit
PB: predicated region body
PF: predicated region fallthrough
CT: control target
= control target key end

     0   :  { %7 = vsyncpa [#allocation3], 0  ;;  %s701_s0 = inlined_call_operand.vmem [shape: f32[20,32], index: 0, kind: input, shape index: {}]   ;;  %s702_s1 = inlined_call_operand.vmem [shape: s32[32,1], index: 1, kind: input, shape index: {}]   ;;  %s703_s2 = inlined_call_operand.vmem [shape: f32[2,1,1], index: 2, kind: output, shape index: {}]  }
   0x1   :  { %9 = vsyncpa [#allocation3 + $0x1], 0  ;;  %s566_s9 = smov 0   ;;  %s568_s10 = smov 0  }
   0x2   :  { %s570_s11 = smov 0   ;;  %s572_s12 = smov 0  }
   0x3   :  { %s574_s13 = smov 0   ;;  %s576_s14 = smov 0  }
   0x4   :  { %s578_s15 = smov 0   ;;  %s580_s16 = smov 0  }
   0x5 LB: > { %s363_s17 = sadd.s32 4294967295, %s547_s16   ;;  %s364_s18 = sadd.s32 4294967294, %s547_s16   ;;  %s547_s16 = sphi %s580_s16, %s15_s16   ;;  %s543_s15 = sphi %s578_s15, %s712_s15   ;;  %s539_s14 = sphi %s576_s14, %s711_s14   ;;  %s535_s13 = sphi %s574_s13, %s710_s13   ;;  %s531_s12 = sphi %s572_s12, %s709_s12   ;;  %s527_s11 = sphi %s570_s11, %s708_s11   ;;  %s523_s10 = sphi %s568_s10, %s707_s10   ;;  %s519_s9 = sphi %s566_s9, %s706_s9  }
   0x6   : > { %s24_s19 = sadd.s32 1, %s539_s14  ;;  %s27_s20 = sadd.s32 1, %s543_s15 }
   0x7   : > { %p25_p0 = scmp.ge.s32.totalorder %s24_s19, 2  ;;  %p108_p1 = scmp.ne.s32.totalorder %s527_s11, %s523_s10 }
   0x8   : > { %p109_p2 = scmp.eq.s32.totalorder %s363_s17, 3  ;;  %p114_p4 = scmp.ne.s32.totalorder %s523_s10, %s519_s9 }
   0x9   : > { %s714_s19 = smov (%p25_p0, %s24_s19), 0  ;;  %s716_s20 = smov (!%p25_p0, %s27_s20), %s543_s15 }
   0xa   : > { %p615_p3 = por %p109_p2, %p108_p1  ;;  %p29_p5 = scmp.ge.s32.totalorder %s716_s20, 2 }
   0xb   : > { %p115_p6 = scmp.eq.s32.totalorder %s364_s18, 3  ;;  %p371_p7 = scmp.ge.s32.totalorder %s547_s16, 1 }
   0xc   : > { %p159_p8 = scmp.lt.s32.totalorder %s547_s16, 5  ;;  %s718_s20 = smov (%p29_p5, %s716_s20), 0 }
   0xd   : > { %p625_p9 = por %p115_p6, %p114_p4  ;;  %s95_s23 = ssub.s32 %s543_s15, %s718_s20 }
   0xe   : > { %p160_p10 = pnand %p371_p7, %p159_p8  ;;  %s98_s24 = sadd.s32 1, %s527_s11 }
   0xf   : > { %p96_p11 = scmp.eq.s32.totalorder %s95_s23, 0  ;;  %s373_s26 = sshll.u32 (!%p160_p10), %s535_s13, 1  ;;  %v549_v0 = vmov (!%p160_p10), 0   ;;  %vm226_vm0 = vcmask (!%p160_p10), 261120   ;;  %v220_v6 = vlaneseq (!%p160_p10)  ;;  %vm254_vm3 = vcmask (!%p160_p10), 7168  }
  0x10   : > { %163 = sbr.rel (%p160_p10) target bundleno = 556 (0x22c), region = 28  ;;  %s637_s27 = sadd.s32 (!%p160_p10), %s531_s12, %s373_s26  ;;  %460 = vset.pattern.permute.xlu0 (!%p160_p10), %v549_v0 }
  0x11   : > { %s633_s25 = scalar_select %p96_p11, %s527_s11, %s98_s24  }
  0x12   : > { %p192_p12 = scmp.lt.s32.totalorder (!%p160_p10), %s637_s27, 2  ;;  %p204_p13 = scmp.lt.s32.totalorder (!%p160_p10), %s637_s27, 3  ;;  %v231_v8 = vand.u32 (!%p160_p10), 127, %v220_v6  ;;  %v221_v18 = vshrl.u32 (!%p160_p10), %v220_v6, 7 }
  0x13   : > { %s382_s18 = sshll.u32 (!%p160_p10), %s637_s27, 3  ;;  %s187_s23 = sand.u32 (!%p160_p10), 1, %s523_s10  }
  0x14   : > { %v223_v19 = vstv (!%p160_p10), %s382_s18  ;;  %p393_p0 = scmp.eq.s32.totalorder (!%p160_p10), %s531_s12, 0  ;;  %s372_s24 = sshll.u32 (!%p160_p10), %s187_s23, 7 }
  0x15   : > { %v224_v20 = vadd.s32 (!%p160_p10), %v223_v19, %v221_v18  ;;  %s655_s26 = scalar_lea.smem (!%p160_p10), [#allocation2], %s372_s24  ;;  %s279_s12 = scalar_lea.vmem (!%p160_p10), %s703_s2, %s535_s13 }
  0x16   : > { %s281_s3 = sshll.u32 (!%p160_p10), %s279_s12, 4  ;;  %s471_s18 = sshll.u32 (!%p160_p10), %s703_s2, 4  ;;  %s282_s3 = int_to_ptr.vmem [resolvable:$true] %s281_s3  ;;  %s472_s18 = int_to_ptr.vmem [resolvable:$false] %s471_s18 }
  0x17   : > { %s193_s28 = scalar_select %p192_p12, %s637_s27, 2  ;;  %vm225_vm2 = vcmp.lt.s32.totalorder %v224_v20, 20 }
  0x18   : > { %s205_s5 = scalar_select %p204_p13, %s637_s27, 3 }
  0x19   : > { %s720_s28 = smov (!%p192_p12, %s193_s28), 2  ;;  %s550_s27 = smov 0.0  }
  0x1a   : > { %s377_s29 = sshll.u32 %s720_s28, 3  ;;  %s379_s6 = sshll.u32 %s205_s5, 3 }
  0x1b   : > { %s197_s4 = scalar_lea.vmem %s701_s0, %s377_s29  ;;  %s207_s17 = scalar_lea.vmem %s702_s1, %s379_s6 }
  0x1c   : > { %v216_v1 = vld [vmem:[%s197_s4] sm:$0xff]  ;;  %390 = sst [smem:[%s655_s26]] (%p393_p0), %s550_s27  ;;  %s269_s6 = scalar_lea.sflag [#allocation3], %s187_s23 }
  0x1d   : > { %v227_v2 = vsel %vm226_vm0, %v216_v1, -inf  ;;  %v217_v3 = vld [vmem:[%s207_s17] sm:$0xff]  ;;  %s383_s28 = sld [smem:[#allocation2 + %s372_s24]]  ;;  %s467_s7 = scalar_lea.vmem %s282_s3, 16 }
  0x1e   : > { %228 = vmax.xlane.f32.xlu0 %v227_v2  ;;  %p468_p1 = scmp.ne.s32.totalorder %s282_s3, %s467_s7  ;;  %s473_s24 = scalar_lea.vmem %s472_s18, 32 }
  0x1f   : > { %p474_p5 = scmp.lt.s32.totalorder %s282_s3, %s472_s18  ;;  %p475_p6 = scmp.lt.s32.totalorder %s473_s24, %s467_s7 }
  0x20   : > { %p469_p2 = pnand %p468_p1, %p615_p3 }
  0x21   : > { %p476_p7 = por %p475_p6, %p474_p5 }
  0x22   : > { %p470_p4 = pneg %p469_p2 }
  0x24   : > { %p477_p8 = pnand %p476_p7, %p470_p4 }
  0x34   : > { %233 = vperm.xlu0 %460, %v217_v3  }
  0xab   : > { %v229_v4 = vpop.xlane.xlu0 %228 }
  0xac   : > { %v240_v5 = vsub.f32 %v216_v1, %v229_v4 }
  0xae   : > { %v241_v7 = vmul.f32 1.442695, %v240_v5 }
  0xb0   : > { %461 = vpow2.f32 %v241_v7 }
  0xb3   : > { %v234_v9 = vpop.permute.xlu0 %233 }
  0xb4   : > { %vm235_vm1 = vcmp.eq.s32.totalorder %v231_v8, %v234_v9 }
  0xb5   : > { %v236_v10 = vsel %vm235_vm1, %v216_v1, 0.0 }
  0xb6   : > { %v237_v11 = vsel %vm226_vm0, %v236_v10, 0.0 }
  0xb7   : > { %238 = vadd.xlane.f32.xlu1 %v237_v11 }
  0xba   : > { %v462_v12 = vpop.eup %461 }
  0xbb   : > { %v243_v13 = vsel %vm226_vm0, %v462_v12, 0.0 }
  0xbc   : > { %244 = vadd.xlane.f32.xlu1 %v243_v13 }
 0x144   : > { %v239_v14 = vpop.xlane.xlu1 %238 }
 0x145   : > { %v246_v15 = vsub.f32 %v239_v14, %v229_v4 }
 0x147   : > { %v247_v16 = vmul.f32 1.442695, %v246_v15 }
 0x149   : > { %463 = vpow2.f32 %v247_v16  ;;  %v245_v17 = vpop.xlane.xlu1 %244 }
 0x14a   : > { %465 = vrcp.f32 %v245_v17 }
 0x153   : > { %v464_v21 = vpop.eup %463 }
 0x154   : > { %v466_v22 = vpop.eup %465 }
 0x155   : > { %v250_v23 = vmul.f32 %v466_v22, %v464_v21 }
 0x157   : > { %v251_v24 = vadd.f32 1e-08, %v250_v23 }
 0x159   : > { %v253_v25 = vsel %vm225_vm2, %v251_v24, 0.0 }
 0x15a   : > { %v255_v26 = vsel %vm254_vm3, %v253_v25, 0.0 }
 0x15b   : > { %256 = vadd.xlane.f32.xlu1 %v255_v26 }
 0x1e8   : > { %v257_v27 = vpop.xlane.xlu1 %256 }
 0x1e9   : > { %v258_v28 = vrot.slane %v257_v27, 4 }
 0x1eb   : > { %v259_v29 = vadd.f32 %v258_v28, %v257_v27 }
 0x1ed   : > { %v260_v30 = vrot.slane %v259_v29, 2 }
 0x1ef   : > { %v261_v31 = vadd.f32 %v260_v30, %v259_v29 }
 0x1f1   : > { %v262_v32 = vrot.slane %v261_v31, 1 }
 0x1f3   : > { %v263_v33 = vadd.f32 %v262_v32, %v261_v31 }
 0x1f5   : > { %387 = vpush %v263_v33 }
 0x226   : > { %s388_s4 = spop %387 }
 0x227   : > { %s265_s5 = sadd.f32 %s388_s4, %s383_s28 }
 0x229   : > { %267 = sst [smem:[%s655_s26]] %s265_s5 }
 0x22a   : > { %480 = shalt.err (!%p477_p8)
}
 0x22b   : > { %391 = dma.smem_to_vmem (%p615_p3), %s655_s26, 16, %s282_s3, %s269_s6  }
 0x22c PF: > { %p386_p10 = scmp.lt.s32.totalorder %s547_s16, 2 }
 0x22d   : > { %s293_s13 = sand.u32 (!%p386_p10), 1, %s519_s9  }
 0x22e   : > { %288 = sbr.rel (%p386_p10) target bundleno = 568 (0x238), region = 40  ;;  %s294_s23 = scalar_lea.sflag (!%p386_p10), [#allocation3], %s293_s13 }
 0x235   : > { %514 = dma.done.wait (%p625_p9), %s294_s23, 16  }
 0x236   : > { %516 = vsyncadd (%p625_p9), %s294_s23, 4294967280 }
 0x237   : > { %299 = sfence }
 0x238 PF: > { %s15_s16 = sadd.s32 1, %s547_s16   ;;  %s706_s9 = smov %s523_s10 }
 0x239   : > { %p12_p11 = scmp.ge.s32.totalorder %s15_s16, 6   ;;  %s707_s10 = smov %s527_s11 }
 0x23a   : > { %s708_s11 = smov %s633_s25  ;;  %s709_s12 = smov %s539_s14 }
 0x23b   : > { %s710_s13 = smov %s543_s15  ;;  %s711_s14 = smov %s714_s19 }
 0x23c   : > { %s712_s15 = smov %s718_s20  ;;  %14 = sbr.rel (!%p12_p11) target bundleno = 5 (0x5), region = 72 }
 0x243   :  { %300 = vsyncpa [#allocation3], 1 }
 0x244   :  { %302 = vsyncpa [#allocation3 + $0x1], 1 }

</bundles_post_ra>
